<compile_context>
chip_gen: v5e
topology: v5e:2x2
jax: 0.10.0
libtpu: 0.0.40
codegen_flags: <defaults>
</compile_context>

<pallas_src>
import functools

import numpy as np
import jax
import jax.numpy as jnp
from jax.experimental import pallas as pl
from jax.experimental.pallas import tpu as pltpu


_PAD = 128  # lane offset of the hidden image inside the flat padded scratch


def _conv_tap_masks(H, W):
    """(9, H*W) f32: 1 where the (dh,dw)-shifted source pixel is in-bounds."""
    hh, ww = np.meshgrid(np.arange(H), np.arange(W), indexing="ij")
    rows = []
    for dh in (-1, 0, 1):
        for dw in (-1, 0, 1):
            valid = ((hh + dh >= 0) & (hh + dh < H) &
                     (ww + dw >= 0) & (ww + dw < W))
            rows.append(valid.reshape(-1).astype(np.float32))
    return jnp.asarray(np.stack(rows, axis=0))


def _fused_gen_kernel(xtap_ref, w1_ref, b1_ref, w2_ref, b2_ref, mask_ref,
                      o_ref, hpad_ref, taps_ref, *, H, W, hidden):
    """Fused Conv3x3+ReLU -> Conv3x3+Tanh for one batch element.

    xtap_ref : (1, 9*Cin, H*W)  bf16  tap-stacked (im2col) input, lane-dense
    w1_ref   : (hidden, 9*Cin)  bf16
    b1_ref   : (hidden, 1)      f32
    w2_ref   : (Cout, 9*hidden) f32
    b2_ref   : (Cout, 1)        f32
    mask_ref : (9, H*W)         f32   per-tap spatial validity masks
    o_ref    : (1, Cout, H*W)   f32   flattened-NCHW output (lane-dense)
    hpad_ref : (hidden, 2*_PAD + H*W) f32 scratch (flat zero-padded hidden)
    taps_ref : (9*hidden, H*W)  f32 scratch (tap-stacked hidden)
    """
    HW = H * W

    # ---- conv1 + bias + ReLU: one lane-dense bf16 MXU matmul, f32 acc. ----
    h = jnp.dot(w1_ref[...], xtap_ref[0], preferred_element_type=jnp.float32)
    h = jnp.maximum(h + b1_ref[...], 0.0)                     # (hidden, H*W)

    # ---- stage hidden in a flat zero-padded scratch (stays in VMEM). ----
    hpad_ref[...] = jnp.zeros_like(hpad_ref)
    hpad_ref[:, _PAD:_PAD + HW] = h                           # vreg-aligned

    # ---- build the 9 conv2 taps: static lane-offset slices + mask. ----
    t = 0
    for dh in (-1, 0, 1):
        for dw in (-1, 0, 1):
            off = dh * W + dw
            tap = hpad_ref[:, _PAD + off:_PAD + off + HW]     # (hidden, H*W)
            taps_ref[t * hidden:(t + 1) * hidden, :] = (
                tap * mask_ref[t:t + 1, :])
            t += 1

    # ---- conv2 + bias + tanh: one MXU matmul over all 9 taps. ----
    y = jnp.dot(w2_ref[...], taps_ref[...],
                preferred_element_type=jnp.float32)           # (Cout, H*W)
    o_ref[0] = jnp.tanh(y + b2_ref[...])


def fused_conv_generator(x_nchw, w1, b1, w2, b2):
    """x: (N, Cin, H, W) f32 -> (N, Cout, H, W) f32 (Conv-ReLU-Conv-Tanh)."""
    N, Cin, H, W = x_nchw.shape
    hidden = w1.shape[-1]
    Cout = w2.shape[-1]
    HW = H * W

    x = x_nchw.astype(jnp.float32)
    xpad = jnp.pad(x, ((0, 0), (0, 0), (1, 1), (1, 1)))
    taps = [xpad[:, :, kh:kh + H, kw:kw + W]
            for kh in range(3) for kw in range(3)]
    # Tap-stacked, lane-dense im2col: (N, 9*Cin, H*W); bf16 at the boundary.
    xtap = jnp.stack(taps, axis=1).reshape(N, 9 * Cin, HW).astype(jnp.bfloat16)

    w1_mat = jnp.transpose(w1, (3, 0, 1, 2)).reshape(hidden, 9 * Cin)
    w1_mat = w1_mat.astype(jnp.bfloat16)
    w2_mat = jnp.transpose(w2, (3, 0, 1, 2)).reshape(Cout, 9 * hidden)
    w2_mat = w2_mat.astype(jnp.float32)
    b1c = b1.reshape(hidden, 1).astype(jnp.float32)
    b2c = b2.reshape(Cout, 1).astype(jnp.float32)
    masks = _conv_tap_masks(H, W)

    kernel = functools.partial(_fused_gen_kernel, H=H, W=W, hidden=hidden)

    out_flat = pl.pallas_call(
        kernel,
        out_shape=jax.ShapeDtypeStruct((N, Cout, HW), jnp.float32),
        grid_spec=pltpu.PrefetchScalarGridSpec(
            num_scalar_prefetch=0,
            grid=(N,),
            in_specs=[
                pl.BlockSpec((1, 9 * Cin, HW), lambda n: (n, 0, 0)),
                pl.BlockSpec((hidden, 9 * Cin), lambda n: (0, 0)),
                pl.BlockSpec((hidden, 1), lambda n: (0, 0)),
                pl.BlockSpec((Cout, 9 * hidden), lambda n: (0, 0)),
                pl.BlockSpec((Cout, 1), lambda n: (0, 0)),
                pl.BlockSpec((9, HW), lambda n: (0, 0)),
            ],
            out_specs=pl.BlockSpec((1, Cout, HW), lambda n: (n, 0, 0)),
            scratch_shapes=[
                pltpu.VMEM((hidden, HW + 2 * _PAD), jnp.float32),
                pltpu.VMEM((9 * hidden, HW), jnp.float32),
            ],
        ),
        compiler_params=pltpu.CompilerParams(
            dimension_semantics=("parallel",),
            vmem_limit_bytes=32 * 1024 * 1024,
        ),
    )(xtap, w1_mat, b1c, w2_mat, b2c, masks)

    # (N, Cout, H*W) IS flattened NCHW -> free reshape, no transpose.
    return out_flat.reshape(N, Cout, H, W)


class Generator:
    """JAX/Pallas port of the PyTorch Generator (num_gpu data-parallel path is
    a no-op on a single device)."""

    def __init__(self, num_gpu, input_channels, output_channels, hidden=8,
                 key=jax.random.PRNGKey(0)):
        self.num_gpu = num_gpu
        k1, k2, k3, k4 = jax.random.split(key, 4)
        self.w1 = (jax.random.normal(k1, (3, 3, input_channels, hidden),
                                     jnp.float32)
                   * (2.0 / (9 * input_channels)) ** 0.5)
        self.b1 = jax.random.normal(k2, (hidden,), jnp.float32) * 0.01
        self.w2 = (jax.random.normal(k3, (3, 3, hidden, output_channels),
                                     jnp.float32)
                   * (2.0 / (9 * hidden)) ** 0.5)
        self.b2 = jax.random.normal(k4, (output_channels,), jnp.float32) * 0.01
        self._forward = jax.jit(fused_conv_generator)

    def forward(self, x_nchw):
        return self._forward(x_nchw, self.w1, self.b1, self.w2, self.b2)

    __call__ = forward


def _reference_forward(x, w1, b1, w2, b2):
    """Pure-JAX reference (mirrors the kernel's bf16 rounding of conv1 ins)."""
    xb = x.astype(jnp.bfloat16).astype(jnp.float32)
    w1b = w1.astype(jnp.bfloat16).astype(jnp.float32)
    dn = ("NCHW", "HWIO", "NCHW")
    h = jax.lax.conv_general_dilated(
        xb, w1b, (1, 1), "SAME", dimension_numbers=dn,
        precision=jax.lax.Precision.HIGHEST)
    h = jnp.maximum(h + b1.reshape(1, -1, 1, 1), 0.0)
    y = jax.lax.conv_general_dilated(
        h, w2, (1, 1), "SAME", dimension_numbers=dn,
        precision=jax.lax.Precision.HIGHEST)
    return jnp.tanh(y + b2.reshape(1, -1, 1, 1))


if __name__ == "__main__":
    N, Cin, Cout, H, W = 2, 4, 4, 16, 16
    key = jax.random.PRNGKey(0)
    x = jax.random.normal(key, (N, Cin, H, W), jnp.float32)

    gen = Generator(num_gpu=1, input_channels=Cin, output_channels=Cout)
    out = gen(x)
    jax.block_until_ready(out)

    assert out.shape == (N, Cout, H, W), out.shape
    assert out.dtype == jnp.float32
    assert bool(jnp.all(jnp.isfinite(out)))
    # Tanh output range sanity check.
    assert bool(jnp.max(jnp.abs(out)) <= 1.0 + 1e-6)

    # Numerical check against a pure-JAX conv reference.
    ref = _reference_forward(x, gen.w1, gen.b1, gen.w2, gen.b2)
    max_err = float(jnp.max(jnp.abs(out - ref)))
    assert max_err < 2e-2, max_err
    print("KERNEL_OK")
</pallas_src>

<mosaic_0001>
module attributes {stable_mosaic.version = 11 : i64} {
  func.func @_fused_gen_kernel(%arg0: i32, %arg1: memref<1x36x256xbf16, #tpu.memory_space<vmem>>, %arg2: memref<8x36xbf16, #tpu.memory_space<vmem>>, %arg3: memref<8x1xf32, #tpu.memory_space<vmem>>, %arg4: memref<4x72xf32, #tpu.memory_space<vmem>>, %arg5: memref<4x1xf32, #tpu.memory_space<vmem>>, %arg6: memref<9x256xf32, #tpu.memory_space<vmem>>, %arg7: memref<1x4x256xf32, #tpu.memory_space<vmem>>, %arg8: memref<8x512xf32, #tpu.memory_space<vmem>>, %arg9: memref<72x256xf32, #tpu.memory_space<vmem>>) attributes {dimension_semantics = [#tpu.dimension_semantics<parallel>], iteration_bounds = array<i64: 2>, scalar_prefetch = 0 : i64, scratch_operands = 2 : i64, tpu.core_type = #tpu.core_type<tc>, window_params = [{transform_indices = @transform_0, window_bounds = array<i64: 1, 36, 256>}, {pipeline_mode = #tpu.pipeline_mode<synchronous>, transform_indices = @transform_1, window_bounds = array<i64: 8, 36>}, {pipeline_mode = #tpu.pipeline_mode<synchronous>, transform_indices = @transform_2, window_bounds = array<i64: 8, 1>}, {pipeline_mode = #tpu.pipeline_mode<synchronous>, transform_indices = @transform_3, window_bounds = array<i64: 4, 72>}, {pipeline_mode = #tpu.pipeline_mode<synchronous>, transform_indices = @transform_4, window_bounds = array<i64: 4, 1>}, {pipeline_mode = #tpu.pipeline_mode<synchronous>, transform_indices = @transform_5, window_bounds = array<i64: 9, 256>}, {transform_indices = @transform_6, window_bounds = array<i64: 1, 4, 256>}]} {
    %c0 = arith.constant 0 : index
    %c0_0 = arith.constant 0 : index
    %0 = vector.load %arg2[%c0, %c0_0] : memref<8x36xbf16, #tpu.memory_space<vmem>>, vector<8x36xbf16>
    %c0_1 = arith.constant 0 : index
    %c0_2 = arith.constant 0 : index
    %c0_3 = arith.constant 0 : index
    %1 = vector.load %arg1[%c0_1, %c0_2, %c0_3] : memref<1x36x256xbf16, #tpu.memory_space<vmem>>, vector<1x36x256xbf16>
    %2 = vector.shape_cast %1 : vector<1x36x256xbf16> to vector<36x256xbf16>
    %cst = arith.constant dense<0.000000e+00> : vector<8x256xf32>
    %3 = tpu.matmul %0, %2, %cst {dimension_numbers = #tpu.dot_dimension_numbers<[1], [0], [0], [1], [0, 0, 1, 1], [], []>} : vector<8x36xbf16>, vector<36x256xbf16>, vector<8x256xf32> -> vector<8x256xf32>
    %c0_4 = arith.constant 0 : index
    %c0_5 = arith.constant 0 : index
    %4 = vector.load %arg3[%c0_4, %c0_5] : memref<8x1xf32, #tpu.memory_space<vmem>>, vector<8x1xf32>
    %5 = vector.broadcast %4 : vector<8x1xf32> to vector<8x256xf32>
    %6 = arith.addf %3, %5 : vector<8x256xf32>
    %cst_6 = arith.constant 0.000000e+00 : f32
    %7 = vector.broadcast %cst_6 : f32 to vector<8x256xf32>
    %8 = arith.maximumf %6, %7 : vector<8x256xf32>
    %cst_7 = arith.constant 0.000000e+00 : f32
    %9 = vector.broadcast %cst_7 : f32 to vector<8x512xf32>
    %c0_8 = arith.constant 0 : index
    %c0_9 = arith.constant 0 : index
    %10 = vector.load %arg8[%c0_8, %c0_9] : memref<8x512xf32, #tpu.memory_space<vmem>>, vector<8x512xf32>
    tpu.vector_store %arg8[%c0_8, %c0_9], %9 {strides = array<i32>} : memref<8x512xf32, #tpu.memory_space<vmem>>, vector<8x512xf32>,
    %c0_10 = arith.constant 0 : index
    %c128 = arith.constant 128 : index
    %11 = vector.load %arg8[%c0_10, %c128] : memref<8x512xf32, #tpu.memory_space<vmem>>, vector<8x256xf32>
    tpu.vector_store %arg8[%c0_10, %c128], %8 {strides = array<i32>} : memref<8x512xf32, #tpu.memory_space<vmem>>, vector<8x256xf32>,
    %c0_11 = arith.constant 0 : index
    %c111 = arith.constant 111 : index
    %12 = vector.load %arg8[%c0_11, %c111] : memref<8x512xf32, #tpu.memory_space<vmem>>, vector<8x256xf32>
    %c0_12 = arith.constant 0 : index
    %c0_13 = arith.constant 0 : index
    %13 = vector.load %arg6[%c0_12, %c0_13] : memref<9x256xf32, #tpu.memory_space<vmem>>, vector<1x256xf32>
    %14 = vector.broadcast %13 : vector<1x256xf32> to vector<8x256xf32>
    %15 = arith.mulf %12, %14 : vector<8x256xf32>
    %c0_14 = arith.constant 0 : index
    %c0_15 = arith.constant 0 : index
    %16 = vector.load %arg9[%c0_14, %c0_15] : memref<72x256xf32, #tpu.memory_space<vmem>>, vector<8x256xf32>
    tpu.vector_store %arg9[%c0_14, %c0_15], %15 {strides = array<i32>} : memref<72x256xf32, #tpu.memory_space<vmem>>, vector<8x256xf32>,
    %c0_16 = arith.constant 0 : index
    %c112 = arith.constant 112 : index
    %17 = vector.load %arg8[%c0_16, %c112] : memref<8x512xf32, #tpu.memory_space<vmem>>, vector<8x256xf32>
    %c1 = arith.constant 1 : index
    %c0_17 = arith.constant 0 : index
    %18 = vector.load %arg6[%c1, %c0_17] : memref<9x256xf32, #tpu.memory_space<vmem>>, vector<1x256xf32>
    %19 = vector.broadcast %18 : vector<1x256xf32> to vector<8x256xf32>
    %20 = arith.mulf %17, %19 : vector<8x256xf32>
    %c8 = arith.constant 8 : index
    %c0_18 = arith.constant 0 : index
    %21 = vector.load %arg9[%c8, %c0_18] : memref<72x256xf32, #tpu.memory_space<vmem>>, vector<8x256xf32>
    tpu.vector_store %arg9[%c8, %c0_18], %20 {strides = array<i32>} : memref<72x256xf32, #tpu.memory_space<vmem>>, vector<8x256xf32>,
    %c0_19 = arith.constant 0 : index
    %c113 = arith.constant 113 : index
    %22 = vector.load %arg8[%c0_19, %c113] : memref<8x512xf32, #tpu.memory_space<vmem>>, vector<8x256xf32>
    %c2 = arith.constant 2 : index
    %c0_20 = arith.constant 0 : index
    %23 = vector.load %arg6[%c2, %c0_20] : memref<9x256xf32, #tpu.memory_space<vmem>>, vector<1x256xf32>
    %24 = vector.broadcast %23 : vector<1x256xf32> to vector<8x256xf32>
    %25 = arith.mulf %22, %24 : vector<8x256xf32>
    %c16 = arith.constant 16 : index
    %c0_21 = arith.constant 0 : index
    %26 = vector.load %arg9[%c16, %c0_21] : memref<72x256xf32, #tpu.memory_space<vmem>>, vector<8x256xf32>
    tpu.vector_store %arg9[%c16, %c0_21], %25 {strides = array<i32>} : memref<72x256xf32, #tpu.memory_space<vmem>>, vector<8x256xf32>,
    %c0_22 = arith.constant 0 : index
    %c127 = arith.constant 127 : index
    %27 = vector.load %arg8[%c0_22, %c127] : memref<8x512xf32, #tpu.memory_space<vmem>>, vector<8x256xf32>
    %c3 = arith.constant 3 : index
    %c0_23 = arith.constant 0 : index
    %28 = vector.load %arg6[%c3, %c0_23] : memref<9x256xf32, #tpu.memory_space<vmem>>, vector<1x256xf32>
    %29 = vector.broadcast %28 : vector<1x256xf32> to vector<8x256xf32>
    %30 = arith.mulf %27, %29 : vector<8x256xf32>
    %c24 = arith.constant 24 : index
    %c0_24 = arith.constant 0 : index
    %31 = vector.load %arg9[%c24, %c0_24] : memref<72x256xf32, #tpu.memory_space<vmem>>, vector<8x256xf32>
    tpu.vector_store %arg9[%c24, %c0_24], %30 {strides = array<i32>} : memref<72x256xf32, #tpu.memory_space<vmem>>, vector<8x256xf32>,
    %c0_25 = arith.constant 0 : index
    %c128_26 = arith.constant 128 : index
    %32 = vector.load %arg8[%c0_25, %c128_26] : memref<8x512xf32, #tpu.memory_space<vmem>>, vector<8x256xf32>
    %c4 = arith.constant 4 : index
    %c0_27 = arith.constant 0 : index
    %33 = vector.load %arg6[%c4, %c0_27] : memref<9x256xf32, #tpu.memory_space<vmem>>, vector<1x256xf32>
    %34 = vector.broadcast %33 : vector<1x256xf32> to vector<8x256xf32>
    %35 = arith.mulf %32, %34 : vector<8x256xf32>
    %c32 = arith.constant 32 : index
    %c0_28 = arith.constant 0 : index
    %36 = vector.load %arg9[%c32, %c0_28] : memref<72x256xf32, #tpu.memory_space<vmem>>, vector<8x256xf32>
    tpu.vector_store %arg9[%c32, %c0_28], %35 {strides = array<i32>} : memref<72x256xf32, #tpu.memory_space<vmem>>, vector<8x256xf32>,
    %c0_29 = arith.constant 0 : index
    %c129 = arith.constant 129 : index
    %37 = vector.load %arg8[%c0_29, %c129] : memref<8x512xf32, #tpu.memory_space<vmem>>, vector<8x256xf32>
    %c5 = arith.constant 5 : index
    %c0_30 = arith.constant 0 : index
    %38 = vector.load %arg6[%c5, %c0_30] : memref<9x256xf32, #tpu.memory_space<vmem>>, vector<1x256xf32>
    %39 = vector.broadcast %38 : vector<1x256xf32> to vector<8x256xf32>
    %40 = arith.mulf %37, %39 : vector<8x256xf32>
    %c40 = arith.constant 40 : index
    %c0_31 = arith.constant 0 : index
    %41 = vector.load %arg9[%c40, %c0_31] : memref<72x256xf32, #tpu.memory_space<vmem>>, vector<8x256xf32>
    tpu.vector_store %arg9[%c40, %c0_31], %40 {strides = array<i32>} : memref<72x256xf32, #tpu.memory_space<vmem>>, vector<8x256xf32>,
    %c0_32 = arith.constant 0 : index
    %c143 = arith.constant 143 : index
    %42 = vector.load %arg8[%c0_32, %c143] : memref<8x512xf32, #tpu.memory_space<vmem>>, vector<8x256xf32>
    %c6 = arith.constant 6 : index
    %c0_33 = arith.constant 0 : index
    %43 = vector.load %arg6[%c6, %c0_33] : memref<9x256xf32, #tpu.memory_space<vmem>>, vector<1x256xf32>
    %44 = vector.broadcast %43 : vector<1x256xf32> to vector<8x256xf32>
    %45 = arith.mulf %42, %44 : vector<8x256xf32>
    %c48 = arith.constant 48 : index
    %c0_34 = arith.constant 0 : index
    %46 = vector.load %arg9[%c48, %c0_34] : memref<72x256xf32, #tpu.memory_space<vmem>>, vector<8x256xf32>
    tpu.vector_store %arg9[%c48, %c0_34], %45 {strides = array<i32>} : memref<72x256xf32, #tpu.memory_space<vmem>>, vector<8x256xf32>,
    %c0_35 = arith.constant 0 : index
    %c144 = arith.constant 144 : index
    %47 = vector.load %arg8[%c0_35, %c144] : memref<8x512xf32, #tpu.memory_space<vmem>>, vector<8x256xf32>
    %c7 = arith.constant 7 : index
    %c0_36 = arith.constant 0 : index
    %48 = vector.load %arg6[%c7, %c0_36] : memref<9x256xf32, #tpu.memory_space<vmem>>, vector<1x256xf32>
    %49 = vector.broadcast %48 : vector<1x256xf32> to vector<8x256xf32>
    %50 = arith.mulf %47, %49 : vector<8x256xf32>
    %c56 = arith.constant 56 : index
    %c0_37 = arith.constant 0 : index
    %51 = vector.load %arg9[%c56, %c0_37] : memref<72x256xf32, #tpu.memory_space<vmem>>, vector<8x256xf32>
    tpu.vector_store %arg9[%c56, %c0_37], %50 {strides = array<i32>} : memref<72x256xf32, #tpu.memory_space<vmem>>, vector<8x256xf32>,
    %c0_38 = arith.constant 0 : index
    %c145 = arith.constant 145 : index
    %52 = vector.load %arg8[%c0_38, %c145] : memref<8x512xf32, #tpu.memory_space<vmem>>, vector<8x256xf32>
    %c8_39 = arith.constant 8 : index
    %c0_40 = arith.constant 0 : index
    %53 = vector.load %arg6[%c8_39, %c0_40] : memref<9x256xf32, #tpu.memory_space<vmem>>, vector<1x256xf32>
    %54 = vector.broadcast %53 : vector<1x256xf32> to vector<8x256xf32>
    %55 = arith.mulf %52, %54 : vector<8x256xf32>
    %c64 = arith.constant 64 : index
    %c0_41 = arith.constant 0 : index
    %56 = vector.load %arg9[%c64, %c0_41] : memref<72x256xf32, #tpu.memory_space<vmem>>, vector<8x256xf32>
    tpu.vector_store %arg9[%c64, %c0_41], %55 {strides = array<i32>} : memref<72x256xf32, #tpu.memory_space<vmem>>, vector<8x256xf32>,
    %c0_42 = arith.constant 0 : index
    %c0_43 = arith.constant 0 : index
    %57 = vector.load %arg4[%c0_42, %c0_43] : memref<4x72xf32, #tpu.memory_space<vmem>>, vector<4x72xf32>
    %c0_44 = arith.constant 0 : index
    %c0_45 = arith.constant 0 : index
    %58 = vector.load %arg9[%c0_44, %c0_45] : memref<72x256xf32, #tpu.memory_space<vmem>>, vector<72x256xf32>
    %cst_46 = arith.constant dense<0.000000e+00> : vector<4x256xf32>
    %59 = tpu.matmul %57, %58, %cst_46 {dimension_numbers = #tpu.dot_dimension_numbers<[1], [0], [0], [1], [0, 0, 1, 1], [], []>} : vector<4x72xf32>, vector<72x256xf32>, vector<4x256xf32> -> vector<4x256xf32>
    %c0_47 = arith.constant 0 : index
    %c0_48 = arith.constant 0 : index
    %60 = vector.load %arg5[%c0_47, %c0_48] : memref<4x1xf32, #tpu.memory_space<vmem>>, vector<4x1xf32>
    %61 = vector.broadcast %60 : vector<4x1xf32> to vector<4x256xf32>
    %62 = arith.addf %59, %61 : vector<4x256xf32>
    %63 = math.tanh %62 : vector<4x256xf32>
    %c0_49 = arith.constant 0 : index
    %c0_50 = arith.constant 0 : index
    %c0_51 = arith.constant 0 : index
    %64 = vector.load %arg7[%c0_49, %c0_50, %c0_51] : memref<1x4x256xf32, #tpu.memory_space<vmem>>, vector<1x4x256xf32>
    %65 = vector.shape_cast %64 : vector<1x4x256xf32> to vector<4x256xf32>
    %66 = vector.shape_cast %63 : vector<4x256xf32> to vector<1x4x256xf32>
    tpu.vector_store %arg7[%c0_49, %c0_50, %c0_51], %66 {strides = array<i32>} : memref<1x4x256xf32, #tpu.memory_space<vmem>>, vector<1x4x256xf32>,
    return
  }
  func.func @transform_0(%arg0: i32) -> (i32, i32, i32) {
    %c0_i32 = arith.constant 0 : i32
    %c0_i32_0 = arith.constant 0 : i32
    %c0_i32_1 = arith.constant 0 : i32
    return %arg0, %c0_i32, %c0_i32_0 : i32, i32, i32
  }
  func.func @transform_1(%arg0: i32) -> (i32, i32) {
    %c0_i32 = arith.constant 0 : i32
    %c0_i32_0 = arith.constant 0 : i32
    %c0_i32_1 = arith.constant 0 : i32
    return %c0_i32, %c0_i32_0 : i32, i32
  }
  func.func @transform_2(%arg0: i32) -> (i32, i32) {
    %c0_i32 = arith.constant 0 : i32
    %c0_i32_0 = arith.constant 0 : i32
    %c0_i32_1 = arith.constant 0 : i32
    return %c0_i32, %c0_i32_0 : i32, i32
  }
  func.func @transform_3(%arg0: i32) -> (i32, i32) {
    %c0_i32 = arith.constant 0 : i32
    %c0_i32_0 = arith.constant 0 : i32
    %c0_i32_1 = arith.constant 0 : i32
    return %c0_i32, %c0_i32_0 : i32, i32
  }
  func.func @transform_4(%arg0: i32) -> (i32, i32) {
    %c0_i32 = arith.constant 0 : i32
    %c0_i32_0 = arith.constant 0 : i32
    %c0_i32_1 = arith.constant 0 : i32
    return %c0_i32, %c0_i32_0 : i32, i32
  }
  func.func @transform_5(%arg0: i32) -> (i32, i32) {
    %c0_i32 = arith.constant 0 : i32
    %c0_i32_0 = arith.constant 0 : i32
    %c0_i32_1 = arith.constant 0 : i32
    return %c0_i32, %c0_i32_0 : i32, i32
  }
  func.func @transform_6(%arg0: i32) -> (i32, i32, i32) {
    %c0_i32 = arith.constant 0 : i32
    %c0_i32_0 = arith.constant 0 : i32
    %c0_i32_1 = arith.constant 0 : i32
    return %arg0, %c0_i32, %c0_i32_0 : i32, i32, i32
  }
}

</mosaic_0001>

<bundles_post_ra>
// kernel: fused_conv_generator.1
= control target key start
LH: loop header
LB: loop body
LE: loop exit
PB: predicated region body
PF: predicated region fallthrough
CT: control target
= control target key end

     0   :  { %s918_s21 = smov 0   ;;  %s1064_s0 = inlined_call_operand.vmem [shape: bf16[2,36,256], index: 0, kind: input, shape index: {}]   ;;  %s1065_s1 = inlined_call_operand.vmem [shape: bf16[8,36], index: 1, kind: input, shape index: {}]   ;;  %s1066_s2 = inlined_call_operand.vmem [shape: f32[8,1], index: 2, kind: input, shape index: {}]   ;;  %s1067_s3 = inlined_call_operand.vmem [shape: f32[4,72], index: 3, kind: input, shape index: {}]   ;;  %s1068_s4 = inlined_call_operand.vmem [shape: f32[4,1], index: 4, kind: input, shape index: {}]   ;;  %s1069_s5 = inlined_call_operand.vmem [shape: f32[9,256], index: 5, kind: input, shape index: {}]   ;;  %s1070_s6 = inlined_call_operand.vmem [shape: f32[2,4,256], index: 6, kind: output, shape index: {}]  }
   0x1 LB: > { %s760_s22 = sadd.s32 4294967295, %s872_s21   ;;  %p764_p0 = scmp.ge.s32.totalorder %s872_s21, 1  ;;  %s872_s21 = sphi %s918_s21, %s16_s21  }
   0x2   : > { %p212_p1 = scmp.lt.s32.totalorder %s872_s21, 3 }
   0x4   : > { %p213_p2 = pnand %p764_p0, %p212_p1 }
   0x5   : > { %p242_p3 = scmp.lt.s32.totalorder (!%p213_p2), %s760_s22, 1  ;;  %s875_s27 = smov (!%p213_p2), 17  }
   0x6   : > { %216 = sbr.rel (%p213_p2) target bundleno = 458 (0x1ca), region = 44  ;;  %s876_s7 = smov (!%p213_p2), 16  }
   0x7   : > { %s877_s15 = smov (!%p213_p2), 15   ;;  %s878_s16 = smov (!%p213_p2), 1  }
   0x8   : > { %s879_s25 = smov (!%p213_p2), 127   ;;  %s880_s29 = smov (!%p213_p2), 113  }
   0xb   : > { %v793_v0 = vld [vmem:[%s1069_s5 + $0x10] ss:$8 sm:$0x3]  ;;  %v259_v1 = vld [vmem:[%s1066_s2] sm:$0xff]  ;;  %v874_v2 = vmov 0   ;;  %s1072_s22 = smov (!%p242_p3, %s760_s22), 1 }
   0xc   : > { %821 = vset.pattern.permute.xlu0 %v874_v2  ;;  %v600_v3 = vperm.slane %v793_v0, 1  ;;  %v792_v4 = vld [vmem:[%s1069_s5 + $0x7] ss:$8 sm:$0x3]  ;;  %v599_v6 = vperm.slane %v793_v0, 0  ;;  %s803_s30 = smul.u32 40, %s1072_s22 }
   0xd   : > { %262 = vperm.xlu0 %821, %v259_v1   ;;  %v566_v5 = vperm.slane %v792_v4, 1  ;;  %v565_v7 = vperm.slane %v792_v4, 0  ;;  %v791_v9 = vld [vmem:[%s1069_s5 + $0x6] ss:$8 sm:$0x3]  ;;  %vm294_vm0 = vcmask 1041408  }
   0xe   : > { %603 = vrot.lane.b32.xlu1 %v600_v3, %s875_s27  ;;  %s246_s10 = scalar_lea.vmem %s1064_s0, %s803_s30  ;;  %v531_v12 = vperm.slane %v791_v9, 0  ;;  %v790_v14 = vld [vmem:[%s1069_s5 + $0x5] ss:$8 sm:$0x3]  ;;  %v532_v22 = vperm.slane %v791_v9, 1  ;;  %vm290_vm1 = vcmask 293888  }
   0xf   : > { %569 = vrot.lane.b32.xlu2 %v566_v5, %s876_s7  ;;  %v258_v8 = vld [vmem:[%s246_s10 + $0x20] sm:$0x33]  ;;  %v778_v13 = vld [vmem:[%s246_s10 + $0x10] sm:$0xf]  ;;  %v802_v17 = vld [vmem:[%s246_s10 + $0x14] sm:$0xf0] }
  0x10   : > { %v278_v10 = vunpack.c.l.b16 %v258_v8  ;;  %v279_v11 = vunpack.c.h.b16 %v258_v8  ;;  %v801_v18 = vld [vmem:[%s246_s10 + $0x14] sm:$0xf]  ;;  %v780_v19 = vld [vmem:[%s246_s10 + $0x18] sm:$0xf0]  ;;  %v779_v23 = vor.u32 %v802_v17, %v778_v13  ;;  %v497_v25 = vperm.slane %v790_v14, 0  ;;  %s881_s30 = smov 112  }
  0x11   : > { %v783_v24 = vor.u32 %v801_v18, %v780_v19  ;;  %v770_v26 = vld [vmem:[%s246_s10] sm:$0xf]  ;;  %v800_v27 = vld [vmem:[%s246_s10 + $0x4] sm:$0xf0]  ;;  %v799_v28 = vld [vmem:[%s246_s10 + $0x4] sm:$0xf] }
  0x12   : > { %v284_v15 = vpack.c.b16 %v278_v10, %v278_v10  ;;  %v285_v16 = vpack.c.b16 %v279_v11, %v279_v11  ;;  %v772_v29 = vld [vmem:[%s246_s10 + $0x8] sm:$0xf0]  ;;  %v498_v30 = vperm.slane %v790_v14, 1  ;;  %v771_v31 = vor.u32 %v800_v27, %v770_v26  ;;  %v788_v33 = vld [vmem:[%s1069_s5 + $0x3] ss:$8 sm:$0x3] }
  0x13   : > { %v775_v32 = vor.u32 %v799_v28, %v772_v29  ;;  %v253_v34 = vld [vmem:[%s1065_s1] sm:$0xf]  ;;  %v448_v35 = vperm.slane %v788_v33, 0  ;;  %v449_v36 = vperm.slane %v788_v33, 1  ;;  %s882_s10 = smov 111   ;;  %vm363_vm2 = vcmask 138240  }
  0x14   : > { %v296_v20 = vsel %vm294_vm0, %v284_v15, 0  ;;  %v299_v21 = vsel %vm294_vm0, %v285_v16, 0  ;;  %v787_v37 = vld [vmem:[%s1069_s5 + $0x2] ss:$8 sm:$0x3]  ;;  %vm399_vm3 = vcmask 130048  }
  0x15   : > { %601 = vrot.lane.b32.xlu0 %v599_v6, %s875_s27  ;;  %306 = vmatpush.bf16.msra.mxu0 %v296_v20  ;;  %v412_v38 = vperm.slane %v787_v37, 0  ;;  %v786_v39 = vld [vmem:[%s1069_s5 + $0x1] ss:$8 sm:$0x3]  ;;  %v413_v40 = vperm.slane %v787_v37, 1  ;;  %vm471_vm4 = vcmask 7168  }
  0x16   : > { %567 = vrot.lane.b32.xlu1 %v565_v7, %s876_s7  ;;  %319 = vmatpush.bf16.msra.mxu1 %v299_v21  ;;  %v376_v41 = vperm.slane %v786_v39, 0  ;;  %v377_v42 = vperm.slane %v786_v39, 1  ;;  %v338_v43 = vld [vmem:[%s1069_s5] ss:$8 sm:$0x3]  ;;  %vm435_vm5 = vcmask 121856  }
  0x17   : > { %533 = vrot.lane.b32.xlu2 %v531_v12, %s877_s15  ;;  %v340_v44 = vperm.slane %v338_v43, 0  ;;  %v341_v45 = vperm.slane %v338_v43, 1  ;;  %vm454_vm6 = vcmask 1039360   ;;  %vm382_vm7 = vcmask 916480  }
  0x18   : > { %vm418_vm8 = vcmask 924672   ;;  %vm346_vm9 = vcmask 908288   ;;  %vm652_vm10 = vcmask 588800   ;;  %vm701_vm11 = vcmask 1043456  }
  0x19   : > { %307 = vmatpush.bf16.msra.mxu0 %v779_v23 }
  0x1a   : > { %320 = vmatpush.bf16.msra.mxu1 %v783_v24 }
  0x1d   : > { %535 = vrot.lane.b32.xlu0 %v532_v22, %s877_s15  ;;  %308 = vmatpush.bf16.msra.mxu0 %v771_v31 }
  0x1e   : > { %499 = vrot.lane.b32.xlu1 %v497_v25, %s878_s16  ;;  %321 = vmatpush.bf16.msra.mxu1 %v775_v32 }
  0x1f   : > { %501 = vrot.lane.b32.xlu2 %v498_v30, %s878_s16 }
  0x20   : > { %784 = vmatmul.msk.bf16.vlgmr.msra.gmra.mxu0 %vm290_vm1, %v253_v34 }
  0x21   : > { %785 = vmatmul.msk.bf16.vlgmr.msra.gmra.mxu1 %vm290_vm1, %v253_v34 }
  0x25   : > { %450 = vrot.lane.b32.xlu0 %v448_v35, %s879_s25 }
  0x26   : > { %452 = vrot.lane.b32.xlu1 %v449_v36, %s879_s25 }
  0x27   : > { %414 = vrot.lane.b32.xlu2 %v412_v38, %s880_s29 }
  0x2d   : > { %416 = vrot.lane.b32.xlu0 %v413_v40, %s880_s29 }
  0x2e   : > { %378 = vrot.lane.b32.xlu1 %v376_v41, %s881_s30 }
  0x2f   : > { %380 = vrot.lane.b32.xlu2 %v377_v42, %s881_s30 }
  0x35   : > { %342 = vrot.lane.b32.xlu0 %v340_v44, %s882_s10 }
  0x36   : > { %344 = vrot.lane.b32.xlu1 %v341_v45, %s882_s10 }
  0x69   : > { %v570_v46 = vpop.permute.xlu2 %569 }
  0x6a   : > { %v577_v7 = vmul.f32 0.0, %v570_v46 }
  0x71   : > { %v978_v47 = vpop.permute.xlu2 %533 }
  0x79   : > { %v502_v48 = vpop.permute.xlu2 %501 }
  0x7a   : > { %v509_v14 = vmul.f32 0.0, %v502_v48 }
  0x7f   : > { %v263_v49 = vpop.permute.xlu0 %262 }
  0x80   : > { %v604_v52 = vpop.permute.xlu1 %603 }
  0x81   : > { %v980_v50 = vpop.permute.xlu2 %414  ;;  %v611_v3 = vmul.f32 0.0, %v604_v52 }
  0x82   : > { %v423_v51 = vmul.f32 0.0, %v980_v50 }
  0x84   : > { %429 = vrot.lane.b32.xlu2 %v423_v51, %s877_s15 }
  0x87   : > { %v602_v53 = vpop.permute.xlu0 %601 }
  0x88   : > { %v568_v55 = vpop.permute.xlu1 %567  ;;  %v605_v2 = vsel %vm363_vm2, %v602_v53, %v604_v52 }
  0x89   : > { %v571_v4 = vsel %vm399_vm3, %v568_v55, %v570_v46  ;;  %v381_v27 = vpop.permute.xlu2 %380 }
  0x8f   : > { %v536_v54 = vpop.permute.xlu0 %535 }
  0x90   : > { %v500_v58 = vpop.permute.xlu1 %499  ;;  %v537_v16 = vsel %vm435_vm5, %v978_v47, %v536_v54  ;;  %v543_v20 = vmul.f32 0.0, %v536_v54 }
  0x91   : > { %v503_v8 = vsel %vm471_vm4, %v500_v58, %v502_v48 }
  0x97   : > { %v451_v56 = vpop.permute.xlu0 %450 }
  0x98   : > { %v459_v57 = vmul.f32 0.0, %v451_v56  ;;  %v453_v63 = vpop.permute.xlu1 %452 }
  0x99   : > { %v455_v22 = vsel %vm454_vm6, %v451_v56, %v453_v63 }
  0x9a   : > { %465 = vrot.lane.b32.xlu0 %v459_v57, %s878_s16 }
  0x9d   : > { %v310_v59 = vpop.f32.mrf.mxu0 }
  0x9e   : > { %v323_v60 = vpop.f32.mrf.mxu1  ;;  %v311_v61 = vadd.f32 %v310_v59, %v263_v49 }
  0x9f   : > { %v324_v62 = vadd.f32 %v323_v60, %v263_v49  ;;  %v417_v19 = vpop.permute.xlu0 %416 }
  0xa0   : > { %v985_v0 = vmax.f32 %v311_v61, 0.0  ;;  %v379_v18 = vpop.permute.xlu1 %378  ;;  %v419_v33 = vsel %vm418_vm8, %v980_v50, %v417_v19 }
  0xa1   : > { %v987_v1 = vmax.f32 %v324_v62, 0.0  ;;  %v383_v29 = vsel %vm382_vm7, %v379_v18, %v381_v27  ;;  %v387_v45 = vmul.f32 0.0, %v379_v18 }
  0xa2   : > { %v609_v5 = vmul.f32 %v602_v53, %v985_v0  ;;  %v575_v24 = vmul.f32 %v568_v55, %v985_v0  ;;  %v460_v25 = vmul.f32 %v455_v22, %v985_v0  ;;  %v541_v32 = vmul.f32 %v978_v47, %v985_v0  ;;  %v646_v47 = vld [vmem:[%s1068_s4] sm:$0xf] }
  0xa3   : > { %v610_v6 = vmul.f32 %v605_v2, %v987_v1  ;;  %v576_v9 = vmul.f32 %v571_v4, %v987_v1  ;;  %v508_v15 = vmul.f32 %v503_v8, %v987_v1  ;;  %v542_v17 = vmul.f32 %v537_v16, %v987_v1 }
  0xa4   : > { %615 = vrot.lane.b32.xlu1 %v609_v5, %s882_s10  ;;  %v461_v26 = vmul.f32 %v453_v63, %v987_v1  ;;  %v507_v34 = vmul.f32 %v500_v58, %v985_v0  ;;  %v388_v35 = vmul.f32 %v383_v29, %v985_v0  ;;  %v389_v36 = vmul.f32 %v381_v27, %v987_v1  ;;  %v789_v63 = vld [vmem:[%s1069_s5 + $0x4] ss:$8 sm:$0x3] }
  0xa5   : > { %v822_v10 = vpack.i.bf16 %v611_v3, %v610_v6  ;;  %v312_v11 = vpop.f32.mrf.mxu0  ;;  %v827_v13 = vpack.i.bf16 %v577_v7, %v576_v9  ;;  %v837_v21 = vpack.i.bf16 %v509_v14, %v508_v15  ;;  %v832_v23 = vpack.i.bf16 %v543_v20, %v542_v17 }
  0xa6   : > { %v325_v12 = vpop.f32.mrf.mxu1  ;;  %v842_v28 = vpack.i.bf16 %v461_v26, %v460_v25  ;;  %v424_v38 = vmul.f32 %v419_v33, %v985_v0  ;;  %v425_v39 = vmul.f32 %v417_v19, %v987_v1  ;;  %v852_v42 = vpack.i.bf16 %v389_v36, %v388_v35 }
  0xa7   : > { %823 = vrot.lane.b32.xlu2 %v822_v10, %s882_s10  ;;  %828 = vrot.lane.b32.xlu0 %v827_v13, %s881_s30  ;;  %v343_v31 = vpop.permute.xlu0 %342  ;;  %v484_v5 = vperm.slane %v789_v63, 1  ;;  %v483_v15 = vperm.slane %v789_v63, 0 }
  0xa8   : > { %v345_v30 = vpop.permute.xlu1 %344  ;;  %v847_v43 = vpack.i.bf16 %v425_v39, %v424_v38  ;;  %v351_v46 = vmul.f32 0.0, %v343_v31 }
  0xa9   : > { %v347_v37 = vsel %vm346_vm9, %v343_v31, %v345_v30  ;;  %v353_v40 = vmul.f32 %v345_v30, %v987_v1  ;;  %v488_v11 = vmul.f32 %v484_v5, %v987_v1  ;;  %v487_v1 = vmul.f32 %v483_v15, %v985_v0 }
  0xaa   : > { %v352_v41 = vmul.f32 %v347_v37, %v985_v0  ;;  %v627_v0 = vld [vmem:[%s1067_s3] sm:$0xf] }
  0xac   : > { %838 = vrot.lane.b32.xlu1 %v837_v21, %s879_s25  ;;  %v857_v44 = vpack.i.bf16 %v353_v40, %v352_v41 }
  0xaf   : > { %833 = vrot.lane.b32.xlu2 %v832_v23, %s880_s29  ;;  %581 = vrot.lane.b32.xlu0 %v575_v24, %s881_s30 }
  0xb4   : > { %843 = vrot.lane.b32.xlu1 %v842_v28, %s878_s16 }
  0xb7   : > { %547 = vrot.lane.b32.xlu2 %v541_v32, %s880_s29  ;;  %513 = vrot.lane.b32.xlu0 %v507_v34, %s879_s25 }
  0xbc   : > { %853 = vrot.lane.b32.xlu1 %v852_v42, %s876_s7 }
  0xbf   : > { %848 = vrot.lane.b32.xlu2 %v847_v43, %s877_s15  ;;  %858 = vrot.lane.b32.xlu0 %v857_v44, %s875_s27  ;;  %s798_s15 = sshll.u32 %s1072_s22, 3 }
  0xc0   : > { %s251_s18 = scalar_lea.vmem %s1070_s6, %s798_s15 }
  0xc4   : > { %393 = vrot.lane.b32.xlu1 %v387_v45, %s876_s7 }
  0xc7   : > { %357 = vrot.lane.b32.xlu2 %v351_v46, %s875_s27  ;;  %649 = vperm.xlu0 %821, %v646_v47  }
  0xde   : > { %v430_v48 = vpop.permute.xlu2 %429 }
 0x101   : > { %v824_v49 = vpop.permute.xlu2 %823 }
 0x102   : > { %v826_v50 = vunpack.i.h.bf16 %v824_v49  ;;  %v825_v51 = vunpack.i.l.bf16 %v824_v49 }
 0x104   : > { %v622_v52 = vsel %vm346_vm9, %v825_v51, %v826_v50 }
 0x105   : > { %683 = vmatpush.msra.mxu3 %v622_v52 }
 0x109   : > { %v834_v54 = vpop.permute.xlu2 %833 }
 0x10a   : > { %v836_v58 = vunpack.i.h.bf16 %v834_v54  ;;  %v835_v59 = vunpack.i.l.bf16 %v834_v54 }
 0x10c   : > { %v466_v53 = vpop.permute.xlu0 %465  ;;  %v554_v3 = vsel %vm418_vm8, %v835_v59, %v836_v58 }
 0x111   : > { %v548_v60 = vpop.permute.xlu2 %547 }
 0x112   : > { %v553_v13 = vsel %vm418_vm8, %v548_v60, %v835_v59 }
 0x116   : > { %v616_v55 = vpop.permute.xlu1 %615 }
 0x117   : > { %v621_v56 = vsel %vm346_vm9, %v616_v55, %v825_v51 }
 0x118   : > { %663 = vmatpush.msra.mxu2 %v621_v56 }
 0x119   : > { %v829_v57 = vpop.permute.xlu0 %828  ;;  %v849_v12 = vpop.permute.xlu2 %848 }
 0x11a   : > { %v831_v61 = vunpack.i.h.bf16 %v829_v57  ;;  %v830_v62 = vunpack.i.l.bf16 %v829_v57  ;;  %v851_v16 = vunpack.i.h.bf16 %v849_v12  ;;  %v850_v17 = vunpack.i.l.bf16 %v849_v12 }
 0x11c   : > { %v588_v2 = vsel %vm382_vm7, %v830_v62, %v831_v61  ;;  %v437_v23 = vsel %vm435_vm5, %v850_v17, %v851_v16  ;;  %v436_v28 = vsel %vm435_vm5, %v430_v48, %v850_v17 }
 0x11d   : > { %684 = vmatpush.msra.mxu3 %v588_v2 }
 0x11e   : > { %v839_v4 = vpop.permute.xlu1 %838 }
 0x11f   : > { %685 = vmatpush.msra.mxu3 %v554_v3  ;;  %v841_v6 = vunpack.i.h.bf16 %v839_v4  ;;  %v840_v7 = vunpack.i.l.bf16 %v839_v4 }
 0x121   : > { %v582_v8 = vpop.permute.xlu0 %581  ;;  %v520_v9 = vsel %vm454_vm6, %v840_v7, %v841_v6  ;;  %v358_v36 = vpop.permute.xlu2 %357 }
 0x122   : > { %v587_v10 = vsel %vm382_vm7, %v582_v8, %v830_v62  ;;  %686 = vmatpush.msra.mxu3 %v520_v9 }
 0x123   : > { %664 = vmatpush.msra.mxu2 %v587_v10 }
 0x124   : > { %687 = vmatpush.msra.mxu3 %v488_v11 }
 0x125   : > { %665 = vmatpush.msra.mxu2 %v553_v13 }
 0x126   : > { %v844_v14 = vpop.permute.xlu1 %843 }
 0x127   : > { %v846_v18 = vunpack.i.h.bf16 %v844_v14  ;;  %v845_v19 = vunpack.i.l.bf16 %v844_v14 }
 0x129   : > { %v514_v20 = vpop.permute.xlu0 %513  ;;  %v473_v21 = vsel %vm471_vm4, %v845_v19, %v846_v18  ;;  %v472_v24 = vsel %vm471_vm4, %v466_v53, %v845_v19 }
 0x12a   : > { %v519_v22 = vsel %vm454_vm6, %v514_v20, %v840_v7  ;;  %688 = vmatpush.msra.mxu3 %v473_v21 }
 0x12b   : > { %666 = vmatpush.msra.mxu2 %v519_v22 }
 0x12c   : > { %689 = vmatpush.msra.mxu3 %v437_v23 }
 0x12d   : > { %667 = vmatpush.msra.mxu2 %v487_v1 }
 0x12e   : > { %v854_v25 = vpop.permute.xlu1 %853 }
 0x12f   : > { %668 = vmatpush.msra.mxu2 %v472_v24  ;;  %v856_v26 = vunpack.i.h.bf16 %v854_v25  ;;  %v855_v27 = vunpack.i.l.bf16 %v854_v25 }
 0x131   : > { %669 = vmatpush.msra.mxu2 %v436_v28  ;;  %v859_v29 = vpop.permute.xlu0 %858  ;;  %v401_v30 = vsel %vm399_vm3, %v855_v27, %v856_v26 }
 0x132   : > { %v861_v31 = vunpack.i.h.bf16 %v859_v29  ;;  %v860_v32 = vunpack.i.l.bf16 %v859_v29  ;;  %690 = vmatpush.msra.mxu3 %v401_v30 }
 0x134   : > { %v365_v33 = vsel %vm363_vm2, %v860_v32, %v861_v31  ;;  %v364_v37 = vsel %vm363_vm2, %v358_v36, %v860_v32 }
 0x135   : > { %691 = vmatpush.msra.mxu3 %v365_v33 }
 0x136   : > { %795 = vmatmul.msk.f32.vlgmr.msra.gmra.mxu3 %vm652_vm10, %v627_v0  ;;  %v394_v34 = vpop.permute.xlu1 %393 }
 0x137   : > { %v400_v35 = vsel %vm399_vm3, %v394_v34, %v855_v27 }
 0x138   : > { %670 = vmatpush.msra.mxu2 %v400_v35 }
 0x139   : > { %v650_v38 = vpop.permute.xlu0 %649 }
 0x13a   : > { %671 = vmatpush.msra.mxu2 %v364_v37 }
 0x13b   : > { %794 = vmatmul.msk.f32.vlgmr.msra.gmra.mxu2 %vm652_vm10, %v627_v0 }
 0x1b9   : > { %v693_v39 = vpop.f32.mrf.mxu3 }
 0x1ba   : > { %v694_v40 = vadd.f32 %v693_v39, %v650_v38 }
 0x1bc   : > { %862 = vtanh.f32 %v694_v40 }
 0x1be   : > { %v673_v41 = vpop.f32.mrf.mxu2 }
 0x1bf   : > { %v674_v42 = vadd.f32 %v673_v41, %v650_v38 }
 0x1c1   : > { %864 = vtanh.f32 %v674_v42 }
 0x1c2   : > { %v863_v43 = vpop.eup %862 }
 0x1c3   : > { %v700_v44 = vrot.slane %v863_v43, 4 }
 0x1c7   : > { %v865_v45 = vpop.eup %864 }
 0x1c8   : > { %v702_v46 = vsel %vm701_vm11, %v865_v45, %v700_v44 }
 0x1c9   : > { %704 = vst [vmem:[%s251_s18] sm:$0xff] %v702_v46 }
 0x1ca PF: > { %s16_s21 = sadd.s32 1, %s872_s21  }
 0x1cb   : > { %p13_p4 = scmp.ge.s32.totalorder %s16_s21, 4  }
 0x1cd   :  { %15 = sbr.rel (!%p13_p4) target bundleno = 1 (0x1), region = 82 }

</bundles_post_ra>
